<compile_context>
chip_gen: v7x
topology: tpu7x:2x2x1
jax: 0.10.0
libtpu: 0.0.40
codegen_flags: <defaults>
</compile_context>

<pallas_src>
import jax
import jax.numpy as jnp
from jax.experimental import pallas as pl
from jax.experimental.pallas import tpu as pltpu

EPS = 1e-5


def _make_kernel(C_in, C_out, K, S, W_q, P, P_store):
    """Conv (tap loop) + InstanceNorm for one batch element."""
    inv_p = 1.0 / float(P)

    def kernel(xw_ref, w_ref, m_ref, o_ref):
        # xw_ref: (1, S*S, C_in, L_in) bf16  stride-unshuffled, zero-padded image
        # w_ref : (K*K, C_out, C_in)   bf16  per-tap filters (VMEM resident)
        # m_ref : (1, P_store)         f32   1.0 on valid output lanes, else 0.0
        # o_ref : (1, C_out, P_store)  f32
        acc = jnp.zeros((C_out, P_store), jnp.float32)
        # Conv2d as an in-VMEM tap loop (static unroll over K*K taps); each tap
        # is a unit-stride lane slice + a small MXU matmul with f32 accumulation.
        for kh in range(K):
            for kw in range(K):
                rs = (kh % S) * S + (kw % S)          # which unshuffled sub-image
                off = (kh // S) * W_q + (kw // S)      # static lane offset
                xs = xw_ref[0, rs, :, pl.ds(off, P_store)]        # (C_in, P_store)
                acc = acc + jnp.dot(w_ref[kh * K + kw], xs,
                                    preferred_element_type=jnp.float32)
        # InstanceNorm2d (affine=False, biased variance) over the valid lanes.
        m = m_ref[...]                                             # (1, P_store)
        ym = acc * m                                               # zero invalid lanes
        s = jnp.sum(ym, axis=-1, keepdims=True)                    # (C_out, 1)
        ss = jnp.sum(ym * acc, axis=-1, keepdims=True)             # (C_out, 1)
        mean = s * inv_p
        var = jnp.maximum(ss * inv_p - mean * mean, 0.0)           # clamp >= 0
        o_ref[0] = ((acc - mean) * jax.lax.rsqrt(var + EPS)).astype(o_ref.dtype)

    return kernel


def downsample_generator(x, weight, bias, *, stride, padding):
    """x: (N, C_in, H, W) NCHW.  weight: (C_out, C_in, K, K).  bias: (C_out,).

    bias is accepted for nn.Conv2d API parity but unused: a per-channel
    constant bias cancels exactly under InstanceNorm2d(affine=False).
    """
    del bias
    N, C_in, H, W = x.shape
    C_out, _, K, _ = weight.shape
    S = stride
    H_out = (H + 2 * padding - K) // S + 1
    W_out = (W + 2 * padding - K) // S + 1
    P = H_out * W_out                       # valid output pixels per channel
    Q = (K - 1) // S                        # window reach in unshuffled coords
    H_q, W_q = H_out + Q, W_out + Q         # unshuffled sub-image extents
    P2 = H_out * W_q                        # kernel lattice (row pitch W_q)
    P_store = pl.cdiv(P2, 128) * 128        # lane-dense store width
    off_max = Q * W_q + Q
    L_in = pl.cdiv(off_max + P_store, 128) * 128   # padded unshuffled lane extent

    # ---- glue (one fused pass over x): bf16 -> pad -> pixel-unshuffle ----
    xb = x.astype(jnp.bfloat16)
    Hp, Wp = S * H_q, S * W_q
    x_pad = jnp.pad(
        xb, ((0, 0), (0, 0),
             (padding, max(0, Hp - H - padding)),
             (padding, max(0, Wp - W - padding))))[:, :, :Hp, :Wp]
    # (N,C,Hp,Wp) -> (N,C,H_q,S,W_q,S) -> (N,S,S,C,H_q,W_q) -> (N,S*S,C,H_q*W_q)
    xu = x_pad.reshape(N, C_in, H_q, S, W_q, S).transpose(0, 3, 5, 1, 2, 4)
    xw = xu.reshape(N, S * S, C_in, H_q * W_q)
    xw = jnp.pad(xw, ((0, 0), (0, 0), (0, 0), (0, L_in - H_q * W_q)))

    # Per-tap filters: (C_out, C_in, K, K) -> (K*K, C_out, C_in), tap = kh*K+kw.
    w_t = weight.transpose(2, 3, 0, 1).reshape(K * K, C_out, C_in)
    w_t = w_t.astype(jnp.bfloat16)

    # Valid-output-lane mask: lane p = ho*W_q + wo is valid iff p < P2, wo < W_out.
    lane = jnp.arange(P_store)
    mask = ((lane < P2) & (lane % W_q < W_out)).astype(jnp.float32).reshape(1, P_store)

    kernel = _make_kernel(C_in, C_out, K, S, W_q, P, P_store)
    out = pl.pallas_call(
        kernel,
        out_shape=jax.ShapeDtypeStruct((N, C_out, P_store), x.dtype),
        grid_spec=pltpu.PrefetchScalarGridSpec(
            num_scalar_prefetch=0,
            grid=(N,),
            in_specs=[
                pl.BlockSpec((1, S * S, C_in, L_in), lambda n: (n, 0, 0, 0)),
                pl.BlockSpec((K * K, C_out, C_in), lambda n: (0, 0, 0)),
                pl.BlockSpec((1, P_store), lambda n: (0, 0)),
            ],
            out_specs=pl.BlockSpec((1, C_out, P_store), lambda n: (n, 0, 0)),
        ),
        compiler_params=pltpu.CompilerParams(
            dimension_semantics=("parallel",),
        ),
    )(xw, w_t, mask)

    # (N, C_out, P_store) -> drop padding / garbage columns -> NCHW.
    out = out[:, :, :P2].reshape(N, C_out, H_out, W_q)[:, :, :, :W_out]
    return out


def _reference(x, weight, bias, *, stride, padding):
    y = jax.lax.conv_general_dilated(
        x, weight,
        window_strides=(stride, stride),
        padding=[(padding, padding), (padding, padding)],
        dimension_numbers=("NCHW", "OIHW", "NCHW"),
    ) + bias.reshape(1, -1, 1, 1)
    mean = jnp.mean(y, axis=(2, 3), keepdims=True)
    var = jnp.mean((y - mean) ** 2, axis=(2, 3), keepdims=True)
    return (y - mean) * jax.lax.rsqrt(var + EPS)


if __name__ == "__main__":
    # DownSample_Generator(in_channels=4, out_channels=8, kernel_size=3, stride=2, padding=1)
    N, C_in, H, W = 2, 4, 16, 16
    C_out, K, stride, padding = 8, 3, 2, 1

    key = jax.random.PRNGKey(0)
    kx, kw, kb = jax.random.split(key, 3)
    x = jax.random.normal(kx, (N, C_in, H, W), dtype=jnp.float32)
    fan_in = C_in * K * K
    bound = 1.0 / (fan_in ** 0.5)
    weight = jax.random.uniform(kw, (C_out, C_in, K, K), jnp.float32, -bound, bound)
    bias = jax.random.uniform(kb, (C_out,), jnp.float32, -bound, bound)

    out = downsample_generator(x, weight, bias, stride=stride, padding=padding)
    out = jax.block_until_ready(out)

    ref = _reference(x, weight, bias, stride=stride, padding=padding)
    assert out.shape == (N, C_out, H // 2, W // 2), out.shape
    # bf16 matmul operands (f32 accumulation) -> relaxed tolerance vs f32 ref.
    err = float(jnp.max(jnp.abs(out - ref)))
    assert jnp.allclose(out, ref, atol=5e-2, rtol=5e-2), err

    print("KERNEL_OK")
</pallas_src>

<mosaic_0001>
module attributes {stable_mosaic.version = 11 : i64} {
  func.func @kernel(%arg0: i32, %arg1: memref<1x4x4x256xbf16, #tpu.memory_space<vmem>>, %arg2: memref<9x8x4xbf16, #tpu.memory_space<vmem>>, %arg3: memref<1x128xf32, #tpu.memory_space<vmem>>, %arg4: memref<1x8x128xf32, #tpu.memory_space<vmem>>) attributes {dimension_semantics = [#tpu.dimension_semantics<parallel>], iteration_bounds = array<i64: 2>, scalar_prefetch = 0 : i64, scratch_operands = 0 : i64, tpu.core_type = #tpu.core_type<tc>, window_params = [{transform_indices = @transform_0, window_bounds = array<i64: 1, 4, 4, 256>}, {pipeline_mode = #tpu.pipeline_mode<synchronous>, transform_indices = @transform_1, window_bounds = array<i64: 9, 8, 4>}, {pipeline_mode = #tpu.pipeline_mode<synchronous>, transform_indices = @transform_2, window_bounds = array<i64: 1, 128>}, {transform_indices = @transform_3, window_bounds = array<i64: 1, 8, 128>}]} {
    %cst = arith.constant 0.000000e+00 : f32
    %0 = vector.broadcast %cst : f32 to vector<8x128xf32>
    %c0 = arith.constant 0 : index
    %c0_0 = arith.constant 0 : index
    %c0_1 = arith.constant 0 : index
    %c0_2 = arith.constant 0 : index
    %1 = vector.load %arg1[%c0, %c0_0, %c0_1, %c0_2] : memref<1x4x4x256xbf16, #tpu.memory_space<vmem>>, vector<1x1x4x128xbf16>
    %2 = vector.shape_cast %1 : vector<1x1x4x128xbf16> to vector<4x128xbf16>
    %c0_3 = arith.constant 0 : index
    %c0_4 = arith.constant 0 : index
    %c0_5 = arith.constant 0 : index
    %3 = vector.load %arg2[%c0_3, %c0_4, %c0_5] : memref<9x8x4xbf16, #tpu.memory_space<vmem>>, vector<1x8x4xbf16>
    %4 = vector.shape_cast %3 : vector<1x8x4xbf16> to vector<8x4xbf16>
    %cst_6 = arith.constant dense<0.000000e+00> : vector<8x128xf32>
    %5 = tpu.matmul %4, %2, %cst_6 {dimension_numbers = #tpu.dot_dimension_numbers<[1], [0], [0], [1], [0, 0, 1, 1], [], []>} : vector<8x4xbf16>, vector<4x128xbf16>, vector<8x128xf32> -> vector<8x128xf32>
    %6 = arith.addf %0, %5 : vector<8x128xf32>
    %c0_7 = arith.constant 0 : index
    %c1 = arith.constant 1 : index
    %c0_8 = arith.constant 0 : index
    %c0_9 = arith.constant 0 : index
    %7 = vector.load %arg1[%c0_7, %c1, %c0_8, %c0_9] : memref<1x4x4x256xbf16, #tpu.memory_space<vmem>>, vector<1x1x4x128xbf16>
    %8 = vector.shape_cast %7 : vector<1x1x4x128xbf16> to vector<4x128xbf16>
    %c1_10 = arith.constant 1 : index
    %c0_11 = arith.constant 0 : index
    %c0_12 = arith.constant 0 : index
    %9 = vector.load %arg2[%c1_10, %c0_11, %c0_12] : memref<9x8x4xbf16, #tpu.memory_space<vmem>>, vector<1x8x4xbf16>
    %10 = vector.shape_cast %9 : vector<1x8x4xbf16> to vector<8x4xbf16>
    %cst_13 = arith.constant dense<0.000000e+00> : vector<8x128xf32>
    %11 = tpu.matmul %10, %8, %cst_13 {dimension_numbers = #tpu.dot_dimension_numbers<[1], [0], [0], [1], [0, 0, 1, 1], [], []>} : vector<8x4xbf16>, vector<4x128xbf16>, vector<8x128xf32> -> vector<8x128xf32>
    %12 = arith.addf %6, %11 : vector<8x128xf32>
    %c0_14 = arith.constant 0 : index
    %c0_15 = arith.constant 0 : index
    %c0_16 = arith.constant 0 : index
    %c1_17 = arith.constant 1 : index
    %13 = vector.load %arg1[%c0_14, %c0_15, %c0_16, %c1_17] : memref<1x4x4x256xbf16, #tpu.memory_space<vmem>>, vector<1x1x4x128xbf16>
    %14 = vector.shape_cast %13 : vector<1x1x4x128xbf16> to vector<4x128xbf16>
    %c2 = arith.constant 2 : index
    %c0_18 = arith.constant 0 : index
    %c0_19 = arith.constant 0 : index
    %15 = vector.load %arg2[%c2, %c0_18, %c0_19] : memref<9x8x4xbf16, #tpu.memory_space<vmem>>, vector<1x8x4xbf16>
    %16 = vector.shape_cast %15 : vector<1x8x4xbf16> to vector<8x4xbf16>
    %cst_20 = arith.constant dense<0.000000e+00> : vector<8x128xf32>
    %17 = tpu.matmul %16, %14, %cst_20 {dimension_numbers = #tpu.dot_dimension_numbers<[1], [0], [0], [1], [0, 0, 1, 1], [], []>} : vector<8x4xbf16>, vector<4x128xbf16>, vector<8x128xf32> -> vector<8x128xf32>
    %18 = arith.addf %12, %17 : vector<8x128xf32>
    %c0_21 = arith.constant 0 : index
    %c2_22 = arith.constant 2 : index
    %c0_23 = arith.constant 0 : index
    %c0_24 = arith.constant 0 : index
    %19 = vector.load %arg1[%c0_21, %c2_22, %c0_23, %c0_24] : memref<1x4x4x256xbf16, #tpu.memory_space<vmem>>, vector<1x1x4x128xbf16>
    %20 = vector.shape_cast %19 : vector<1x1x4x128xbf16> to vector<4x128xbf16>
    %c3 = arith.constant 3 : index
    %c0_25 = arith.constant 0 : index
    %c0_26 = arith.constant 0 : index
    %21 = vector.load %arg2[%c3, %c0_25, %c0_26] : memref<9x8x4xbf16, #tpu.memory_space<vmem>>, vector<1x8x4xbf16>
    %22 = vector.shape_cast %21 : vector<1x8x4xbf16> to vector<8x4xbf16>
    %cst_27 = arith.constant dense<0.000000e+00> : vector<8x128xf32>
    %23 = tpu.matmul %22, %20, %cst_27 {dimension_numbers = #tpu.dot_dimension_numbers<[1], [0], [0], [1], [0, 0, 1, 1], [], []>} : vector<8x4xbf16>, vector<4x128xbf16>, vector<8x128xf32> -> vector<8x128xf32>
    %24 = arith.addf %18, %23 : vector<8x128xf32>
    %c0_28 = arith.constant 0 : index
    %c3_29 = arith.constant 3 : index
    %c0_30 = arith.constant 0 : index
    %c0_31 = arith.constant 0 : index
    %25 = vector.load %arg1[%c0_28, %c3_29, %c0_30, %c0_31] : memref<1x4x4x256xbf16, #tpu.memory_space<vmem>>, vector<1x1x4x128xbf16>
    %26 = vector.shape_cast %25 : vector<1x1x4x128xbf16> to vector<4x128xbf16>
    %c4 = arith.constant 4 : index
    %c0_32 = arith.constant 0 : index
    %c0_33 = arith.constant 0 : index
    %27 = vector.load %arg2[%c4, %c0_32, %c0_33] : memref<9x8x4xbf16, #tpu.memory_space<vmem>>, vector<1x8x4xbf16>
    %28 = vector.shape_cast %27 : vector<1x8x4xbf16> to vector<8x4xbf16>
    %cst_34 = arith.constant dense<0.000000e+00> : vector<8x128xf32>
    %29 = tpu.matmul %28, %26, %cst_34 {dimension_numbers = #tpu.dot_dimension_numbers<[1], [0], [0], [1], [0, 0, 1, 1], [], []>} : vector<8x4xbf16>, vector<4x128xbf16>, vector<8x128xf32> -> vector<8x128xf32>
    %30 = arith.addf %24, %29 : vector<8x128xf32>
    %c0_35 = arith.constant 0 : index
    %c2_36 = arith.constant 2 : index
    %c0_37 = arith.constant 0 : index
    %c1_38 = arith.constant 1 : index
    %31 = vector.load %arg1[%c0_35, %c2_36, %c0_37, %c1_38] : memref<1x4x4x256xbf16, #tpu.memory_space<vmem>>, vector<1x1x4x128xbf16>
    %32 = vector.shape_cast %31 : vector<1x1x4x128xbf16> to vector<4x128xbf16>
    %c5 = arith.constant 5 : index
    %c0_39 = arith.constant 0 : index
    %c0_40 = arith.constant 0 : index
    %33 = vector.load %arg2[%c5, %c0_39, %c0_40] : memref<9x8x4xbf16, #tpu.memory_space<vmem>>, vector<1x8x4xbf16>
    %34 = vector.shape_cast %33 : vector<1x8x4xbf16> to vector<8x4xbf16>
    %cst_41 = arith.constant dense<0.000000e+00> : vector<8x128xf32>
    %35 = tpu.matmul %34, %32, %cst_41 {dimension_numbers = #tpu.dot_dimension_numbers<[1], [0], [0], [1], [0, 0, 1, 1], [], []>} : vector<8x4xbf16>, vector<4x128xbf16>, vector<8x128xf32> -> vector<8x128xf32>
    %36 = arith.addf %30, %35 : vector<8x128xf32>
    %c0_42 = arith.constant 0 : index
    %c0_43 = arith.constant 0 : index
    %c0_44 = arith.constant 0 : index
    %c9 = arith.constant 9 : index
    %37 = vector.load %arg1[%c0_42, %c0_43, %c0_44, %c9] : memref<1x4x4x256xbf16, #tpu.memory_space<vmem>>, vector<1x1x4x128xbf16>
    %38 = vector.shape_cast %37 : vector<1x1x4x128xbf16> to vector<4x128xbf16>
    %c6 = arith.constant 6 : index
    %c0_45 = arith.constant 0 : index
    %c0_46 = arith.constant 0 : index
    %39 = vector.load %arg2[%c6, %c0_45, %c0_46] : memref<9x8x4xbf16, #tpu.memory_space<vmem>>, vector<1x8x4xbf16>
    %40 = vector.shape_cast %39 : vector<1x8x4xbf16> to vector<8x4xbf16>
    %cst_47 = arith.constant dense<0.000000e+00> : vector<8x128xf32>
    %41 = tpu.matmul %40, %38, %cst_47 {dimension_numbers = #tpu.dot_dimension_numbers<[1], [0], [0], [1], [0, 0, 1, 1], [], []>} : vector<8x4xbf16>, vector<4x128xbf16>, vector<8x128xf32> -> vector<8x128xf32>
    %42 = arith.addf %36, %41 : vector<8x128xf32>
    %c0_48 = arith.constant 0 : index
    %c1_49 = arith.constant 1 : index
    %c0_50 = arith.constant 0 : index
    %c9_51 = arith.constant 9 : index
    %43 = vector.load %arg1[%c0_48, %c1_49, %c0_50, %c9_51] : memref<1x4x4x256xbf16, #tpu.memory_space<vmem>>, vector<1x1x4x128xbf16>
    %44 = vector.shape_cast %43 : vector<1x1x4x128xbf16> to vector<4x128xbf16>
    %c7 = arith.constant 7 : index
    %c0_52 = arith.constant 0 : index
    %c0_53 = arith.constant 0 : index
    %45 = vector.load %arg2[%c7, %c0_52, %c0_53] : memref<9x8x4xbf16, #tpu.memory_space<vmem>>, vector<1x8x4xbf16>
    %46 = vector.shape_cast %45 : vector<1x8x4xbf16> to vector<8x4xbf16>
    %cst_54 = arith.constant dense<0.000000e+00> : vector<8x128xf32>
    %47 = tpu.matmul %46, %44, %cst_54 {dimension_numbers = #tpu.dot_dimension_numbers<[1], [0], [0], [1], [0, 0, 1, 1], [], []>} : vector<8x4xbf16>, vector<4x128xbf16>, vector<8x128xf32> -> vector<8x128xf32>
    %48 = arith.addf %42, %47 : vector<8x128xf32>
    %c0_55 = arith.constant 0 : index
    %c0_56 = arith.constant 0 : index
    %c0_57 = arith.constant 0 : index
    %c10 = arith.constant 10 : index
    %49 = vector.load %arg1[%c0_55, %c0_56, %c0_57, %c10] : memref<1x4x4x256xbf16, #tpu.memory_space<vmem>>, vector<1x1x4x128xbf16>
    %50 = vector.shape_cast %49 : vector<1x1x4x128xbf16> to vector<4x128xbf16>
    %c8 = arith.constant 8 : index
    %c0_58 = arith.constant 0 : index
    %c0_59 = arith.constant 0 : index
    %51 = vector.load %arg2[%c8, %c0_58, %c0_59] : memref<9x8x4xbf16, #tpu.memory_space<vmem>>, vector<1x8x4xbf16>
    %52 = vector.shape_cast %51 : vector<1x8x4xbf16> to vector<8x4xbf16>
    %cst_60 = arith.constant dense<0.000000e+00> : vector<8x128xf32>
    %53 = tpu.matmul %52, %50, %cst_60 {dimension_numbers = #tpu.dot_dimension_numbers<[1], [0], [0], [1], [0, 0, 1, 1], [], []>} : vector<8x4xbf16>, vector<4x128xbf16>, vector<8x128xf32> -> vector<8x128xf32>
    %54 = arith.addf %48, %53 : vector<8x128xf32>
    %c0_61 = arith.constant 0 : index
    %c0_62 = arith.constant 0 : index
    %55 = vector.load %arg3[%c0_61, %c0_62] : memref<1x128xf32, #tpu.memory_space<vmem>>, vector<1x128xf32>
    %56 = vector.broadcast %55 : vector<1x128xf32> to vector<8x128xf32>
    %57 = arith.mulf %54, %56 : vector<8x128xf32>
    %cst_63 = arith.constant dense<0.000000e+00> : vector<8xf32>
    %58 = vector.multi_reduction <add>, %57, %cst_63 [1] : vector<8x128xf32> to vector<8xf32>
    %59 = vector.shape_cast %58 : vector<8xf32> to vector<8x1xf32>
    %60 = arith.mulf %57, %54 : vector<8x128xf32>
    %cst_64 = arith.constant dense<0.000000e+00> : vector<8xf32>
    %61 = vector.multi_reduction <add>, %60, %cst_64 [1] : vector<8x128xf32> to vector<8xf32>
    %62 = vector.shape_cast %61 : vector<8xf32> to vector<8x1xf32>
    %cst_65 = arith.constant 1.562500e-02 : f32
    %63 = vector.broadcast %cst_65 : f32 to vector<8x1xf32>
    %64 = arith.mulf %59, %63 : vector<8x1xf32>
    %cst_66 = arith.constant 1.562500e-02 : f32
    %65 = vector.broadcast %cst_66 : f32 to vector<8x1xf32>
    %66 = arith.mulf %62, %65 : vector<8x1xf32>
    %67 = arith.mulf %64, %64 : vector<8x1xf32>
    %68 = arith.subf %66, %67 : vector<8x1xf32>
    %cst_67 = arith.constant 0.000000e+00 : f32
    %69 = vector.broadcast %cst_67 : f32 to vector<8x1xf32>
    %70 = arith.maximumf %68, %69 : vector<8x1xf32>
    %71 = vector.broadcast %64 : vector<8x1xf32> to vector<8x128xf32>
    %72 = arith.subf %54, %71 : vector<8x128xf32>
    %cst_68 = arith.constant 9.99999974E-6 : f32
    %73 = vector.broadcast %cst_68 : f32 to vector<8x1xf32>
    %74 = arith.addf %70, %73 : vector<8x1xf32>
    %75 = math.rsqrt %74 : vector<8x1xf32>
    %76 = vector.broadcast %75 : vector<8x1xf32> to vector<8x128xf32>
    %77 = arith.mulf %72, %76 : vector<8x128xf32>
    %c0_69 = arith.constant 0 : index
    %c0_70 = arith.constant 0 : index
    %c0_71 = arith.constant 0 : index
    %78 = vector.load %arg4[%c0_69, %c0_70, %c0_71] : memref<1x8x128xf32, #tpu.memory_space<vmem>>, vector<1x8x128xf32>
    %79 = vector.shape_cast %78 : vector<1x8x128xf32> to vector<8x128xf32>
    %80 = vector.shape_cast %77 : vector<8x128xf32> to vector<1x8x128xf32>
    tpu.vector_store %arg4[%c0_69, %c0_70, %c0_71], %80 {strides = array<i32>} : memref<1x8x128xf32, #tpu.memory_space<vmem>>, vector<1x8x128xf32>,
    return
  }
  func.func @transform_0(%arg0: i32) -> (i32, i32, i32, i32) {
    %c0_i32 = arith.constant 0 : i32
    %c0_i32_0 = arith.constant 0 : i32
    %c0_i32_1 = arith.constant 0 : i32
    %c0_i32_2 = arith.constant 0 : i32
    return %arg0, %c0_i32, %c0_i32_0, %c0_i32_1 : i32, i32, i32, i32
  }
  func.func @transform_1(%arg0: i32) -> (i32, i32, i32) {
    %c0_i32 = arith.constant 0 : i32
    %c0_i32_0 = arith.constant 0 : i32
    %c0_i32_1 = arith.constant 0 : i32
    %c0_i32_2 = arith.constant 0 : i32
    return %c0_i32, %c0_i32_0, %c0_i32_1 : i32, i32, i32
  }
  func.func @transform_2(%arg0: i32) -> (i32, i32) {
    %c0_i32 = arith.constant 0 : i32
    %c0_i32_0 = arith.constant 0 : i32
    %c0_i32_1 = arith.constant 0 : i32
    return %c0_i32, %c0_i32_0 : i32, i32
  }
  func.func @transform_3(%arg0: i32) -> (i32, i32, i32) {
    %c0_i32 = arith.constant 0 : i32
    %c0_i32_0 = arith.constant 0 : i32
    %c0_i32_1 = arith.constant 0 : i32
    return %arg0, %c0_i32, %c0_i32_0 : i32, i32, i32
  }
}

</mosaic_0001>

<bundles_post_ra>
// kernel: tpu_custom_call.1
= control target key start
LH: loop header
LB: loop body
LE: loop exit
PB: predicated region body
PF: predicated region fallthrough
CT: control target
= control target key end

     0   :  { %8 = vsyncpa [#allocation3], 0  ;;  %s1258_s0 = inlined_call_operand.vmem [shape: bf16[2,4,4,256], index: 0, kind: input, shape index: {}]   ;;  %s1259_s1 = inlined_call_operand.vmem [shape: bf16[9,8,4], index: 1, kind: input, shape index: {}]   ;;  %s1260_s2 = inlined_call_operand.vmem [shape: f32[1,128], index: 2, kind: input, shape index: {}]   ;;  %s1261_s3 = inlined_call_operand.hbm [shape: f32[2,8,128], index: 3, kind: output, shape index: {}]  }
   0x1   :  { %10 = vsyncpa [#allocation3 + $0x1], 0  ;;  %s1068_s12 = smov 0   ;;  %s1070_s13 = smov 0  }
   0x2   :  { %s1072_s14 = smov 0   ;;  %s1074_s15 = smov 0  }
   0x3 LB: > { %s1089_s16 = sadd.s32 4294967295, %s1040_s15   ;;  %s791_s17 = sadd.s32 4294967294, %s1040_s15   ;;  %s1040_s15 = sphi %s1074_s15, %s1267_s15   ;;  %s1036_s14 = sphi %s1072_s14, %s1266_s14   ;;  %s1032_s13 = sphi %s1070_s13, %s1265_s13   ;;  %s1028_s12 = sphi %s1068_s12, %s1264_s12  }
   0x4   : > { %s1093_s18 = sadd.s32 1, %s1040_s15   ;;  %s91_s19 = sadd.s32 1, %s1036_s14 }
   0x5   : > { %s88_s20 = ssub.s32 %s1040_s15, %s1093_s18  ;;  %p101_p0 = scmp.ne.s32.totalorder %s1036_s14, %s1032_s13 }
   0x6   : > { %p89_p1 = scmp.eq.s32.totalorder %s88_s20, 0  ;;  %p102_p2 = scmp.eq.s32.totalorder %s1089_s16, 1 }
   0x7   : > { %p107_p3 = scmp.ne.s32.totalorder %s1032_s13, %s1028_s12  ;;  %p108_p4 = scmp.eq.s32.totalorder %s791_s17, 1 }
   0x8   : > { %s1104_s21 = scalar_select %p89_p1, %s1036_s14, %s91_s19  }
   0x9   : > { %p1106_p5 = por %p102_p2, %p101_p0  ;;  %p1110_p6 = por %p108_p4, %p107_p3 }
   0xa   : > { %p794_p7 = scmp.ge.s32.totalorder %s1040_s15, 1  ;;  %p140_p8 = scmp.lt.s32.totalorder %s1040_s15, 3 }
   0xc   : > { %p141_p9 = pnand %p794_p7, %p140_p8 }
   0xd   : > { %p164_p10 = scmp.lt.s32.totalorder (!%p141_p9), %s1089_s16, 1  ;;  %v1042_v0 = vmov (!%p141_p9), 0.0   ;;  %vm1043_vm0 = vmmov (!%p141_p9), 0   ;;  %vm180_vm1 = vcmask (!%p141_p9), 1041408   ;;  %s1044_s29 = smov (!%p141_p9), 119   ;;  %vm176_vm2 = vcmask (!%p141_p9), 31744  }
   0xe   : > { %144 = sbr.rel (%p141_p9) target bundleno = 582 (0x246), region = 32  ;;  %849 = vmatprep.subr.bf16.mxu1 (!%p141_p9), %v1042_v0  ;;  %851 = vmatprep.mubr.msk.bf16.mxu1 (!%p141_p9), %vm1043_vm0, %v1042_v0  ;;  %s1045_s30 = smov (!%p141_p9), 127   ;;  %v799_v7 = vld [vmem:[%s1259_s1 + $0x4] sm:$0xf] (!%p141_p9)  ;;  %v809_v11 = vld [vmem:[%s1259_s1 + $0x10] sm:$0xf] (!%p141_p9) }
   0xf   : > { %873 = vmatprep.subr.bf16.mxu0 (!%p141_p9), %v1042_v0  ;;  %875 = vmatprep.mubr.msk.bf16.mxu0 (!%p141_p9), %vm1043_vm0, %v1042_v0  ;;  %v171_v15 = vld [vmem:[%s1259_s1] sm:$0xf] (!%p141_p9)  ;;  %s1046_s10 = smov (!%p141_p9), 118   ;;  %vm517_vm3 = vcmask (!%p141_p9), 973824   ;;  %vm286_vm4 = vcmask (!%p141_p9), 1039360   ;;  %vm646_vm5 = vcmask (!%p141_p9), 965632  }
  0x10   : > { %v812_v24 = vld [vmem:[%s1259_s1 + $0x14] sm:$0xf] (!%p141_p9)  ;;  %v802_v30 = vld [vmem:[%s1259_s1 + $0x8] sm:$0xf] (!%p141_p9)  ;;  %v815_v35 = vld [vmem:[%s1259_s1 + $0x18] sm:$0xf] (!%p141_p9) }
  0x11   : > { %v806_v37 = vld [vmem:[%s1259_s1 + $0xc] sm:$0xf] (!%p141_p9)  ;;  %v819_v41 = vld [vmem:[%s1259_s1 + $0x1c] sm:$0xf] (!%p141_p9)  ;;  %v822_v43 = vld [vmem:[%s1259_s1 + $0x20] sm:$0xf] (!%p141_p9) }
  0x12   : > { %v825_v49 = vld [vmem:[%s1260_s2] ss:$0 sm:$0xff] (!%p141_p9)  ;;  %s161_s7 = sand.u32 (!%p141_p9), 1, %s1032_s13   ;;  %s827_s9 = sshll.u32 (!%p141_p9), %s1089_s16, 7 }
  0x13   : > { %s795_s8 = sshll.u32 (!%p141_p9), %s161_s7, 3  ;;  %s1216_s20 = scalar_lea.hbm (!%p141_p9), %s1261_s3, %s827_s9 }
  0x15   : > { %s165_s24 = scalar_select %p164_p10, %s1089_s16, 1 }
  0x16   : > { %s1047_s16 = smov [#allocation2]  }
  0x17   : > { %s830_s25 = sshll.u32 %s165_s24, 4  ;;  %s719_s24 = scalar_lea.sflag [#allocation3], %s161_s7 }
  0x18   : > { %s1127_s28 = scalar_lea.vmem %s1258_s0, %s830_s25  ;;  %s982_s26 = sshll.u32 %s1047_s16, 4  ;;  %s983_s26 = int_to_ptr.vmem [resolvable:$false] %s982_s26 }
  0x19   : > { %v816_v1 = vld.sshfl [vmem:[%s1127_s28] sm:$0x33 pattern:$0x76325410]  ;;  %v798_v2 = vld [vmem:[%s1127_s28 + $0x4] sm:$0x3] }
  0x1a   : > { %513 = vrot.lane.b32.xlu1 %v816_v1, %s1044_s29  ;;  %v512_v3 = vcombine.high %v816_v1, %v816_v1  ;;  %v813_v4 = vld.sshfl [vmem:[%s1127_s28 + $0x8] sm:$0x33 pattern:$0x76325410]  ;;  %v182_v5 = vsel %vm180_vm1, %v798_v2, 0  ;;  %s984_s27 = scalar_lea.vmem %s983_s26, 256 }
  0x1b   : > { %449 = vrot.lane.b32.xlu0 %v813_v4, %s1045_s30  ;;  %v448_v6 = vcombine.high %v813_v4, %v813_v4  ;;  %850 = vmatpush3.bf16.msra.mxu1 %v182_v5  ;;  %v808_v8 = vld [vmem:[%s1127_s28 + $0xc] sm:$0x3]  ;;  %v170_v10 = vld [vmem:[%s1127_s28] sm:$0x3]  ;;  %v805_v28 = vld [vmem:[%s1127_s28 + $0x8] sm:$0x3] }
  0x1c   : > { %v394_v9 = vsel %vm180_vm1, %v808_v8, 0  ;;  %855 = vmatprep.subr.bf16.mxu1 %v1042_v0  ;;  %v228_v12 = vsel %vm180_vm1, %v170_v10, 0  ;;  %v820_v13 = vld.sshfl [vmem:[%s1127_s28 + $0x4] sm:$0x33 pattern:$0x76325410] }
  0x1d   : > { %874 = vmatpush3.bf16.msra.mxu0 %v394_v9  ;;  %v577_v14 = vcombine.high %v820_v13, %v820_v13  ;;  %v343_v31 = vsel %vm180_vm1, %v805_v28, 0 }
  0x1e   : > { %515 = vrot.lane.b32.xlu1 %v512_v3, %s1044_s29  ;;  %852 = vmatmul.mubr.msk.bf16.vlgmr.msra.gmra.mrb[0].mxu1 %vm176_vm2, %v799_v7 }
  0x1f   : > { %451 = vrot.lane.b32.xlu0 %v448_v6, %s1045_s30  ;;  %856 = vmatpush3.bf16.msra.mxu1 %v228_v12 }
  0x20   : > { %876 = vmatmul.mubr.msk.bf16.vlgmr.msra.gmra.mrb[0].mxu0 %vm176_vm2, %v809_v11  ;;  %857 = vmatprep.mubr.msk.bf16.mxu1 %vm1043_vm0, %v1042_v0 }
  0x21   : > { %879 = vmatprep.subr.bf16.mxu0 %v1042_v0  ;;  %881 = vmatprep.mubr.msk.bf16.mxu0 %vm1043_vm0, %v1042_v0 }
  0x22   : > { %284 = vrot.lane.b32.xlu1 %v512_v3, %s1045_s30  ;;  %861 = vmatprep.subr.bf16.mxu1 %v1042_v0 }
  0x23   : > { %282 = vrot.lane.b32.xlu0 %v816_v1, %s1045_s30 }
  0x26   : > { %580 = vrot.lane.b32.xlu1 %v577_v14, %s1044_s29 }
  0x27   : > { %578 = vrot.lane.b32.xlu0 %v820_v13, %s1044_s29 }
  0x2a   : > { %644 = vrot.lane.b32.xlu1 %v512_v3, %s1046_s10  ;;  %858 = vmatmul.mubr.msk.bf16.vlgmr.msra.gmra.mrb[0].mxu1 %vm176_vm2, %v171_v15 }
  0x2b   : > { %642 = vrot.lane.b32.xlu0 %v816_v1, %s1046_s10  ;;  %863 = vmatprep.mubr.msk.bf16.mxu1 %vm1043_vm0, %v1042_v0  ;;  %s163_s10 = scalar_lea.vmem [#allocation2], %s795_s8 }
  0x2c   : > { %s732_s11 = sshll.u32 %s163_s10, 4  ;;  %s1218_s11 = int_to_ptr.vmem [resolvable:$true] %s732_s11 }
  0x2d   : > { %s978_s25 = scalar_lea.vmem %s1218_s11, 128  ;;  %p985_p0 = scmp.lt.s32.totalorder %s1218_s11, %s983_s26 }
  0x2e   : > { %p979_p11 = scmp.ne.s32.totalorder %s1218_s11, %s978_s25  ;;  %p986_p1 = scmp.lt.s32.totalorder %s984_s27, %s978_s25 }
  0x30   : > { %p980_p12 = pnand %p979_p11, %p1106_p5  ;;  %p987_p2 = por %p986_p1, %p985_p0 }
  0x32   : > { %p981_p13 = pneg %p980_p12 }
  0x34   : > { %p988_p3 = pnand %p987_p2, %p981_p13 }
  0x8c   : > { %v514_v16 = vpop.permute.xlu1 %513 }
  0x8d   : > { %v450_v17 = vpop.permute.xlu0 %449 }
  0x90   : > { %v516_v18 = vpop.permute.xlu1 %515 }
  0x91   : > { %v452_v19 = vpop.permute.xlu0 %451  ;;  %v518_v20 = vsel %vm517_vm3, %v514_v16, %v516_v18 }
  0x92   : > { %v453_v21 = vsel %vm286_vm4, %v450_v17, %v452_v19  ;;  %v523_v25 = vsel %vm180_vm1, %v518_v20, 0 }
  0x93   : > { %v458_v22 = vsel %vm180_vm1, %v453_v21, 0 }
  0x94   : > { %880 = vmatpush3.bf16.msra.mxu0 %v458_v22  ;;  %v285_v23 = vpop.permute.xlu1 %284 }
  0x95   : > { %v283_v26 = vpop.permute.xlu0 %282  ;;  %885 = vmatprep.subr.bf16.mxu0 %v1042_v0 }
  0x96   : > { %v287_v27 = vsel %vm286_vm4, %v283_v26, %v285_v23 }
  0x97   : > { %v292_v29 = vsel %vm180_vm1, %v287_v27, 0  ;;  %882 = vmatmul.mubr.msk.bf16.vlgmr.msra.gmra.mrb[0].mxu0 %vm176_vm2, %v812_v24 }
  0x98   : > { %862 = vmatpush3.bf16.msra.mxu1 %v292_v29  ;;  %886 = vmatpush3.bf16.msra.mxu0 %v523_v25  ;;  %v581_v33 = vpop.permute.xlu1 %580 }
  0x99   : > { %887 = vmatprep.mubr.msk.bf16.mxu0 %vm1043_vm0, %v1042_v0  ;;  %867 = vmatprep.subr.bf16.mxu1 %v1042_v0  ;;  %v579_v32 = vpop.permute.xlu0 %578 }
  0x9a   : > { %891 = vmatprep.subr.bf16.mxu0 %v1042_v0  ;;  %v582_v34 = vsel %vm517_vm3, %v579_v32, %v581_v33 }
  0x9b   : > { %864 = vmatmul.mubr.msk.bf16.vlgmr.msra.gmra.mrb[0].mxu1 %vm176_vm2, %v802_v30  ;;  %v587_v36 = vsel %vm180_vm1, %v582_v34, 0 }
  0x9c   : > { %868 = vmatpush3.bf16.msra.mxu1 %v343_v31  ;;  %869 = vmatprep.mubr.msk.bf16.mxu1 %vm1043_vm0, %v1042_v0  ;;  %v645_v39 = vpop.permute.xlu1 %644 }
  0x9d   : > { %v643_v38 = vpop.permute.xlu0 %642 }
  0x9e   : > { %v647_v40 = vsel %vm646_vm5, %v643_v38, %v645_v39 }
  0x9f   : > { %v652_v42 = vsel %vm180_vm1, %v647_v40, 0 }
  0xa3   : > { %888 = vmatmul.mubr.msk.bf16.vlgmr.msra.gmra.mrb[0].mxu0 %vm176_vm2, %v815_v35 }
  0xa4   : > { %892 = vmatpush3.bf16.msra.mxu0 %v587_v36  ;;  %893 = vmatprep.mubr.msk.bf16.mxu0 %vm1043_vm0, %v1042_v0 }
  0xa5   : > { %897 = vmatprep.subr.bf16.mxu0 %v1042_v0 }
  0xa7   : > { %870 = vmatmul.mubr.msk.bf16.vlgmr.msra.gmra.mrb[0].mxu1 %vm176_vm2, %v806_v37 }
  0xaf   : > { %894 = vmatmul.mubr.msk.bf16.vlgmr.msra.gmra.mrb[0].mxu0 %vm176_vm2, %v819_v41 }
  0xb0   : > { %898 = vmatpush3.bf16.msra.mxu0 %v652_v42  ;;  %899 = vmatprep.mubr.msk.bf16.mxu0 %vm1043_vm0, %v1042_v0 }
  0xbb   : > { %900 = vmatmul.mubr.msk.bf16.vlgmr.msra.gmra.mrb[0].mxu0 %vm176_vm2, %v822_v43 }
 0x17a   : > { %v379_v44 = vpop.f32.mrb[0].mxu1 }
 0x17b   : > { %v871_v45 = vpop.f32.mrb[1].mxu1 }
 0x17c   : > { %v382_v46 = vpop.f32.mrb[2].mxu1 }
 0x17d   : > { %v872_v47 = vpop.f32.mrb[3].mxu1 }
 0x18e   : > { %v688_v48 = vpop.f32.mrb[0].mxu0 }
 0x18f   : > { %v903_v50 = vadd.f32 %v688_v48, %v379_v44  ;;  %v901_v51 = vpop.f32.mrb[1].mxu0 }
 0x190   : > { %v691_v52 = vpop.f32.mrb[2].mxu0 }
 0x191   : > { %v902_v53 = vpop.f32.mrb[3].mxu0  ;;  %v702_v54 = vmul.f32 %v903_v50, %v825_v49 }
 0x193   : > { %703 = vadd.xlane.f32.xlu0 %v702_v54  ;;  %v705_v55 = vmul.f32 %v903_v50, %v702_v54 }
 0x195   : > { %706 = vadd.xlane.f32.xlu1 %v705_v55 }
 0x220   : > { %v704_v56 = vpop.xlane.xlu0 %703 }
 0x221   : > { %v708_v57 = vmul.f32 0.015625, %v704_v56 }
 0x222   : > { %v707_v58 = vpop.xlane.xlu1 %706 }
 0x223   : > { %v710_v59 = vmul.f32 %v708_v57, %v708_v57  ;;  %v709_v60 = vmul.f32 0.015625, %v707_v58  ;;  %v713_v0 = vsub.f32 %v903_v50, %v708_v57 }
 0x225   : > { %v711_v61 = vsub.f32 %v709_v60, %v710_v59 }
 0x227   : > { %v712_v62 = vmax.f32 %v711_v61, 0.0 }
 0x229   : > { %v714_v63 = vadd.f32 1e-05, %v712_v62 }
 0x22b   : > { %976 = vrsqrt.f32 %v714_v63 }
 0x235   : > { %v977_v1 = vpop.eup %976 }
 0x236   : > { %v716_v2 = vmul.f32 %v977_v1, %v713_v0 }
 0x238   : > { %717 = vst [vmem:[%s163_s10] sm:$0xff] %v716_v2 }
 0x239   : > { %991 = shalt.err (!%p988_p3)
}
 0x23a   : > { %s992_s28 = scalar_lea.hbm %s1216_s20, 128  ;;  %s996_s4 = scalar_lea.hbm %s1261_s3, 256 }
 0x23b   : > { %p993_p4 = scmp.ne.s32.totalorder %s1216_s20, %s992_s28  ;;  %p997_p9 = scmp.lt.u32.totalorder %s1216_s20, %s1261_s3 }
 0x23c   : > { %p998_p10 = scmp.lt.u32.totalorder %s996_s4, %s992_s28  ;;  %p1000_p12 = scmp.lt.u32.totalorder %s992_s28, %s1216_s20 }
 0x23d   : > { %p994_p7 = pnand %p993_p4, %p1106_p5 }
 0x23e   : > { %p999_p11 = por %p998_p10, %p997_p9 }
 0x23f   : > { %p995_p8 = pneg %p994_p7 }
 0x240   : > { %p1001_p13 = por %p1000_p12, %p999_p11 }
 0x242   : > { %p1002_p0 = pnand %p1001_p13, %p995_p8 }
 0x244   : > { %1005 = shalt.err (!%p1002_p0)
}
 0x245   : > { %932 = dma.vmem_to_hbm [thread:$0]  (%p1106_p5), %s1218_s11, 128, %s1216_s20, %s719_s24  }
 0x246 PF: > { %p938_p1 = scmp.ge.s32.totalorder %s1040_s15, 2  ;;  %s744_s7 = sand.u32 1, %s1028_s12  }
 0x247   : > { %s745_s8 = scalar_lea.sflag [#allocation3], %s744_s7 }
 0x248   : > { %p935_p2 = pnand %p938_p1, %p1110_p6 }
 0x24a   : > { %1023 = dma.done.wait (!%p935_p2), %s745_s8, 128  }
 0x24b   : > { %1025 = vsyncadd (!%p935_p2), %s745_s8, 4294967168  ;;  %p13_p3 = scmp.ge.s32.totalorder %s1093_s18, 4   ;;  %s1264_s12 = smov %s1032_s13 }
 0x24c   : > { %s1265_s13 = smov %s1036_s14  ;;  %s1266_s14 = smov %s1104_s21 }
 0x24d   : > { %s1267_s15 = smov %s1093_s18  ;;  %15 = sbr.rel (!%p13_p3) target bundleno = 3 (0x3), region = 78 }
 0x254   :  { %750 = vsyncpa [#allocation3], 1 }
 0x255   :  { %752 = vsyncpa [#allocation3 + $0x1], 1 }

</bundles_post_ra>
